<compile_context>
chip_gen: v7x
topology: tpu7x:2x2x1
jax: 0.10.0
libtpu: 0.0.40
codegen_flags: <defaults>
</compile_context>

<pallas_src>
import functools

import jax
import jax.numpy as jnp
from jax import lax
from jax.experimental import pallas as pl
from jax.experimental.pallas import tpu as pltpu

EPS = 1e-5
LANE = 128          # f32 lane width
SUBLANE = 8         # f32 sublane height
DEFAULT_TN = 512    # batch-tile target (HBM-bound regime; clamped by VMEM budget)
WEIGHT_DTYPE = jnp.bfloat16   # MXU-native matmul operand dtype (f32 accumulate)

_SINGLE_BUFFER_WEIGHTS = None   # lazily probed: pl.Buffered(1) support


def _round_up(x, m):
    return (x + m - 1) // m * m


def _cdiv(a, b):
    return -(-a // b)


# ---------------------------------------------------------------------------
# Kernel: one batch tile, both (folded) linears + residual + ReLU.
# ---------------------------------------------------------------------------
def residual_block_kernel(x_ref, w1t_ref, b1_ref, w2t_ref, b2_ref, o_ref):
    # Linear1 (+ folded BN1); Dropout(p=0.5) is identity in eval mode.
    # Matmul operands in bf16 (MXU-native), accumulate in f32.
    h = jnp.dot(x_ref[...].astype(WEIGHT_DTYPE), w1t_ref[...],
                preferred_element_type=jnp.float32) + b1_ref[...]
    h = jnp.maximum(h, 0.0)                                          # ReLU
    # Linear2 (+ folded BN2)
    h = jnp.dot(h.astype(WEIGHT_DTYPE), w2t_ref[...],
                preferred_element_type=jnp.float32) + b2_ref[...]
    # Residual add + final ReLU. Re-read the VMEM-resident x tile here instead
    # of holding a (TN, Cp) f32 value live across both MXU passes.
    o_ref[...] = jnp.maximum(h + x_ref[...], 0.0)


# ---------------------------------------------------------------------------
# One-time parameter preparation: fold BN into Linear, transpose, pad, cast.
# ---------------------------------------------------------------------------
def prepare_params(params, eps=EPS):
    c_out, c_in = params["w1"].shape
    assert c_in == c_out, "shortcut=None requires inchannel == outchannel"
    c = c_out
    c_pad = _round_up(max(c, LANE), LANE)

    # Fold BN1 into Linear1: y = ((xW1^T + b1) - rm1) * s1 + be1, s1 = g1/sqrt(rv1+eps)
    s1 = params["g1"] * lax.rsqrt(params["rv1"] + eps)
    w1f = params["w1"] * s1[:, None]                            # (out, in)
    b1f = (params["b1"] - params["rm1"]) * s1 + params["be1"]
    # Fold BN2 into Linear2.
    s2 = params["g2"] * lax.rsqrt(params["rv2"] + eps)
    w2f = params["w2"] * s2[:, None]
    b2f = (params["b2"] - params["rm2"]) * s2 + params["be2"]

    def pad_w(w):   # (out, in) -> transposed, lane-padded (Cp, Cp), bf16
        wt = jnp.pad(w.T, ((0, c_pad - c), (0, c_pad - c)))
        return wt.astype(WEIGHT_DTYPE)

    def pad_b(b):   # (C,) -> (1, Cp) f32
        return jnp.pad(b, (0, c_pad - c))[None, :].astype(jnp.float32)

    return {
        "w1t": pad_w(w1f), "b1": pad_b(b1f),
        "w2t": pad_w(w2f), "b2": pad_b(b2f),
        "c": c, "c_pad": c_pad,
    }


# ---------------------------------------------------------------------------
# Generation-aware VMEM capacity / tiling selection.
# ---------------------------------------------------------------------------
def _vmem_capacity_bytes():
    try:
        return int(pltpu.get_tpu_info().vmem_capacity_bytes)
    except Exception:
        return 64 * 2**20   # conservative (v7x per-TC) if the query is unavailable


def _choose_tiling(n, c_pad, tn_target, vmem_cap):
    """Pick the batch tile so that (a) the double-buffered x/out tiles fit the
    VMEM budget next to the resident weights, (b) v7x's two TensorCores both
    get grid steps when the batch allows, (c) padding waste is minimized."""
    n_aligned = _round_up(max(n, SUBLANE), SUBLANE)

    # Resident bytes independent of TN: both bf16 weights + f32 biases,
    # conservatively x2 in case they end up double-buffered anyway.
    w_itemsize = jnp.dtype(WEIGHT_DTYPE).itemsize
    weight_bytes = 2 * (2 * c_pad * c_pad * w_itemsize + 2 * c_pad * 4)

    headroom = 8 * 2**20
    per_row = 6 * c_pad * 4          # x/out double-buffered f32 + bf16 staging
    tile_budget = max(vmem_cap - weight_bytes - headroom, SUBLANE * per_row)
    tn_max = max((tile_budget // per_row) // SUBLANE * SUBLANE, SUBLANE)

    tn = min(_round_up(tn_target, SUBLANE), tn_max, n_aligned)
    # Give both v7x TensorCores work when the batch is big enough.
    if n_aligned >= 2 * SUBLANE:
        tn = min(tn, _round_up(_cdiv(n_aligned, 2), SUBLANE))
    # Equalize tiles across the grid to minimize padded garbage rows.
    num_tiles = _cdiv(n_aligned, tn)
    tn = _round_up(_cdiv(n_aligned, num_tiles), SUBLANE)
    n_pad = num_tiles * tn
    return tn, n_pad, weight_bytes


# ---------------------------------------------------------------------------
# Host wrapper: pad the batch, launch the batch-tiled pallas_call, slice back.
# ---------------------------------------------------------------------------
@functools.partial(jax.jit,
                   static_argnames=("tn", "vmem_limit", "single_buffer_weights"))
def _residual_block_padded(x_pad, w1t, b1, w2t, b2, tn, vmem_limit,
                           single_buffer_weights):
    n_pad, c_pad = x_pad.shape
    grid = (n_pad // tn,)

    res_kwargs = {}
    if single_buffer_weights:
        # Constant index_map => never re-DMA'd; single-buffer to halve resident
        # footprint (matters under v7x's 64 MiB per-TC VMEM).
        res_kwargs = dict(pipeline_mode=pl.Buffered(1))

    x_spec = pl.BlockSpec((tn, c_pad), lambda i: (i, 0))
    w_spec = pl.BlockSpec((c_pad, c_pad), lambda i: (0, 0), **res_kwargs)
    b_spec = pl.BlockSpec((1, c_pad), lambda i: (0, 0), **res_kwargs)

    return pl.pallas_call(
        residual_block_kernel,
        out_shape=jax.ShapeDtypeStruct((n_pad, c_pad), jnp.float32),
        grid=grid,
        in_specs=[x_spec, w_spec, b_spec, w_spec, b_spec],
        out_specs=x_spec,
        input_output_aliases={0: 0},   # out tile overwrites its fully-read x tile
        compiler_params=pltpu.CompilerParams(
            dimension_semantics=("parallel",),
            vmem_limit_bytes=vmem_limit,
        ),
    )(x_pad, w1t, b1, w2t, b2)


def residual_block(x, prep, tn_target=DEFAULT_TN):
    """x: (N, C) float32. prep: output of prepare_params (folded/padded)."""
    global _SINGLE_BUFFER_WEIGHTS
    n, c = x.shape
    assert c == prep["c"]
    c_pad = prep["c_pad"]

    vmem_cap = _vmem_capacity_bytes()
    tn, n_pad, weight_bytes = _choose_tiling(n, c_pad, tn_target, vmem_cap)

    # Scoped-VMEM request: actual residency need with 2x scratch headroom,
    # capped below physical VMEM per generation (~48 MiB v7x, ~112 MiB v5e/v6e).
    need = weight_bytes + 6 * tn * c_pad * 4
    cap = max(vmem_cap - 16 * 2**20, 32 * 2**20)
    vmem_limit = int(min(max(2 * need, 16 * 2**20), cap))

    x_pad = jnp.pad(x, ((0, n_pad - n), (0, c_pad - c)))
    args = (x_pad, prep["w1t"], prep["b1"], prep["w2t"], prep["b2"])

    if _SINGLE_BUFFER_WEIGHTS is None:
        # Probe pl.Buffered(1) support once; fall back silently if rejected.
        try:
            out = jax.block_until_ready(
                _residual_block_padded(*args, tn=tn, vmem_limit=vmem_limit,
                                       single_buffer_weights=True))
            _SINGLE_BUFFER_WEIGHTS = True
            return out[:n, :c]
        except Exception:
            _SINGLE_BUFFER_WEIGHTS = False

    out = _residual_block_padded(*args, tn=tn, vmem_limit=vmem_limit,
                                 single_buffer_weights=_SINGLE_BUFFER_WEIGHTS)
    return out[:n, :c]


# ---------------------------------------------------------------------------
# Deterministic synthetic parameters matching nn.Linear / nn.BatchNorm1d shapes.
# ---------------------------------------------------------------------------
def init_params(key, inchannel, outchannel):
    ks = jax.random.split(key, 8)
    bound1 = 1.0 / jnp.sqrt(inchannel)
    bound2 = 1.0 / jnp.sqrt(outchannel)
    return {
        "w1": jax.random.uniform(ks[0], (outchannel, inchannel), jnp.float32, -bound1, bound1),
        "b1": jax.random.uniform(ks[1], (outchannel,), jnp.float32, -bound1, bound1),
        "g1": 1.0 + 0.1 * jax.random.normal(ks[2], (outchannel,), jnp.float32),
        "be1": 0.1 * jax.random.normal(ks[3], (outchannel,), jnp.float32),
        "rm1": 0.05 * jax.random.normal(ks[4], (outchannel,), jnp.float32),
        "rv1": jnp.abs(1.0 + 0.1 * jax.random.normal(ks[5], (outchannel,), jnp.float32)),
        "w2": jax.random.uniform(ks[6], (outchannel, outchannel), jnp.float32, -bound2, bound2),
        "b2": jax.random.uniform(ks[7], (outchannel,), jnp.float32, -bound2, bound2),
        "g2": 1.0 + 0.1 * jax.random.normal(jax.random.fold_in(key, 100), (outchannel,), jnp.float32),
        "be2": 0.1 * jax.random.normal(jax.random.fold_in(key, 101), (outchannel,), jnp.float32),
        "rm2": 0.05 * jax.random.normal(jax.random.fold_in(key, 102), (outchannel,), jnp.float32),
        "rv2": jnp.abs(1.0 + 0.1 * jax.random.normal(jax.random.fold_in(key, 103), (outchannel,), jnp.float32)),
    }


def reference(x, p):
    """Pure-JAX f32 reference of the eval-mode forward (unfolded BN)."""
    h = x @ p["w1"].T + p["b1"]
    h = (h - p["rm1"]) / jnp.sqrt(p["rv1"] + EPS) * p["g1"] + p["be1"]
    h = jnp.maximum(h, 0.0)
    h = h @ p["w2"].T + p["b2"]
    h = (h - p["rm2"]) / jnp.sqrt(p["rv2"] + EPS) * p["g2"] + p["be2"]
    return jnp.maximum(h + x, 0.0)


if __name__ == "__main__":
    key = jax.random.PRNGKey(0)
    k_x, k_p = jax.random.split(key)

    batch, inchannel, outchannel = 8, 32, 32   # shortcut=None => in == out
    x = jax.random.normal(k_x, (batch, inchannel), jnp.float32)
    params = init_params(k_p, inchannel, outchannel)

    prep = prepare_params(params)              # one-time: fold BN, transpose, pad, bf16
    out = residual_block(x, prep)
    out = jax.block_until_ready(out)

    ref = reference(x, params)
    assert out.shape == (batch, outchannel)
    # bf16 matmul operands (f32 accumulate) => looser tolerance vs f32 reference.
    assert jnp.allclose(out, ref, atol=1e-1, rtol=1e-1), "mismatch vs JAX reference"

    print("KERNEL_OK")
</pallas_src>

<mosaic_0001>
module attributes {stable_mosaic.version = 11 : i64} {
  func.func @residual_block_kernel(%arg0: i32, %arg1: memref<8x128xf32, #tpu.memory_space<vmem>>, %arg2: memref<128x128xbf16, #tpu.memory_space<vmem>>, %arg3: memref<1x128xf32, #tpu.memory_space<vmem>>, %arg4: memref<128x128xbf16, #tpu.memory_space<vmem>>, %arg5: memref<1x128xf32, #tpu.memory_space<vmem>>, %arg6: memref<8x128xf32, #tpu.memory_space<vmem>>) attributes {dimension_semantics = [#tpu.dimension_semantics<parallel>], iteration_bounds = array<i64: 1>, scalar_prefetch = 0 : i64, scratch_operands = 0 : i64, tpu.core_type = #tpu.core_type<tc>, window_params = [{transform_indices = @transform_0, window_bounds = array<i64: 8, 128>}, {pipeline_mode = #tpu.pipeline_mode<synchronous>, transform_indices = @transform_1, window_bounds = array<i64: 128, 128>}, {pipeline_mode = #tpu.pipeline_mode<synchronous>, transform_indices = @transform_2, window_bounds = array<i64: 1, 128>}, {pipeline_mode = #tpu.pipeline_mode<synchronous>, transform_indices = @transform_3, window_bounds = array<i64: 128, 128>}, {pipeline_mode = #tpu.pipeline_mode<synchronous>, transform_indices = @transform_4, window_bounds = array<i64: 1, 128>}, {transform_indices = @transform_5, window_bounds = array<i64: 8, 128>}]} {
    %c0 = arith.constant 0 : index
    %c0_0 = arith.constant 0 : index
    %0 = vector.load %arg1[%c0, %c0_0] : memref<8x128xf32, #tpu.memory_space<vmem>>, vector<8x128xf32>
    %1 = arith.truncf %0 : vector<8x128xf32> to vector<8x128xbf16>
    %c0_1 = arith.constant 0 : index
    %c0_2 = arith.constant 0 : index
    %2 = vector.load %arg2[%c0_1, %c0_2] : memref<128x128xbf16, #tpu.memory_space<vmem>>, vector<128x128xbf16>
    %cst = arith.constant dense<0.000000e+00> : vector<8x128xf32>
    %3 = tpu.matmul %1, %2, %cst {dimension_numbers = #tpu.dot_dimension_numbers<[1], [0], [0], [1], [0, 0, 1, 1], [], []>} : vector<8x128xbf16>, vector<128x128xbf16>, vector<8x128xf32> -> vector<8x128xf32>
    %c0_3 = arith.constant 0 : index
    %c0_4 = arith.constant 0 : index
    %4 = vector.load %arg3[%c0_3, %c0_4] : memref<1x128xf32, #tpu.memory_space<vmem>>, vector<1x128xf32>
    %5 = vector.broadcast %4 : vector<1x128xf32> to vector<8x128xf32>
    %6 = arith.addf %3, %5 : vector<8x128xf32>
    %cst_5 = arith.constant 0.000000e+00 : f32
    %7 = vector.broadcast %cst_5 : f32 to vector<8x128xf32>
    %8 = arith.maximumf %6, %7 : vector<8x128xf32>
    %9 = arith.truncf %8 : vector<8x128xf32> to vector<8x128xbf16>
    %c0_6 = arith.constant 0 : index
    %c0_7 = arith.constant 0 : index
    %10 = vector.load %arg4[%c0_6, %c0_7] : memref<128x128xbf16, #tpu.memory_space<vmem>>, vector<128x128xbf16>
    %cst_8 = arith.constant dense<0.000000e+00> : vector<8x128xf32>
    %11 = tpu.matmul %9, %10, %cst_8 {dimension_numbers = #tpu.dot_dimension_numbers<[1], [0], [0], [1], [0, 0, 1, 1], [], []>} : vector<8x128xbf16>, vector<128x128xbf16>, vector<8x128xf32> -> vector<8x128xf32>
    %c0_9 = arith.constant 0 : index
    %c0_10 = arith.constant 0 : index
    %12 = vector.load %arg5[%c0_9, %c0_10] : memref<1x128xf32, #tpu.memory_space<vmem>>, vector<1x128xf32>
    %13 = vector.broadcast %12 : vector<1x128xf32> to vector<8x128xf32>
    %14 = arith.addf %11, %13 : vector<8x128xf32>
    %c0_11 = arith.constant 0 : index
    %c0_12 = arith.constant 0 : index
    %15 = vector.load %arg1[%c0_11, %c0_12] : memref<8x128xf32, #tpu.memory_space<vmem>>, vector<8x128xf32>
    %16 = arith.addf %14, %15 : vector<8x128xf32>
    %cst_13 = arith.constant 0.000000e+00 : f32
    %17 = vector.broadcast %cst_13 : f32 to vector<8x128xf32>
    %18 = arith.maximumf %16, %17 : vector<8x128xf32>
    %c0_14 = arith.constant 0 : index
    %c0_15 = arith.constant 0 : index
    %19 = vector.load %arg6[%c0_14, %c0_15] : memref<8x128xf32, #tpu.memory_space<vmem>>, vector<8x128xf32>
    tpu.vector_store %arg6[%c0_14, %c0_15], %18 {strides = array<i32>} : memref<8x128xf32, #tpu.memory_space<vmem>>, vector<8x128xf32>,
    return
  }
  func.func @transform_0(%arg0: i32) -> (i32, i32) {
    %c0_i32 = arith.constant 0 : i32
    %c0_i32_0 = arith.constant 0 : i32
    return %arg0, %c0_i32 : i32, i32
  }
  func.func @transform_1(%arg0: i32) -> (i32, i32) {
    %c0_i32 = arith.constant 0 : i32
    %c0_i32_0 = arith.constant 0 : i32
    %c0_i32_1 = arith.constant 0 : i32
    return %c0_i32, %c0_i32_0 : i32, i32
  }
  func.func @transform_2(%arg0: i32) -> (i32, i32) {
    %c0_i32 = arith.constant 0 : i32
    %c0_i32_0 = arith.constant 0 : i32
    %c0_i32_1 = arith.constant 0 : i32
    return %c0_i32, %c0_i32_0 : i32, i32
  }
  func.func @transform_3(%arg0: i32) -> (i32, i32) {
    %c0_i32 = arith.constant 0 : i32
    %c0_i32_0 = arith.constant 0 : i32
    %c0_i32_1 = arith.constant 0 : i32
    return %c0_i32, %c0_i32_0 : i32, i32
  }
  func.func @transform_4(%arg0: i32) -> (i32, i32) {
    %c0_i32 = arith.constant 0 : i32
    %c0_i32_0 = arith.constant 0 : i32
    %c0_i32_1 = arith.constant 0 : i32
    return %c0_i32, %c0_i32_0 : i32, i32
  }
  func.func @transform_5(%arg0: i32) -> (i32, i32) {
    %c0_i32 = arith.constant 0 : i32
    %c0_i32_0 = arith.constant 0 : i32
    return %arg0, %c0_i32 : i32, i32
  }
}

module attributes {stable_mosaic.version = 11 : i64} {
  func.func @residual_block_kernel(%arg0: i32, %arg1: memref<8x128xf32, #tpu.memory_space<vmem>>, %arg2: memref<128x128xbf16, #tpu.memory_space<vmem>>, %arg3: memref<1x128xf32, #tpu.memory_space<vmem>>, %arg4: memref<128x128xbf16, #tpu.memory_space<vmem>>, %arg5: memref<1x128xf32, #tpu.memory_space<vmem>>, %arg6: memref<8x128xf32, #tpu.memory_space<vmem>>) attributes {dimension_semantics = [#tpu.dimension_semantics<parallel>], iteration_bounds = array<i64: 1>, scalar_prefetch = 0 : i64, scratch_operands = 0 : i64, tpu.core_type = #tpu.core_type<tc>, window_params = [{transform_indices = @transform_0, window_bounds = array<i64: 8, 128>}, {pipeline_mode = #tpu.pipeline_mode<synchronous>, transform_indices = @transform_1, window_bounds = array<i64: 128, 128>}, {pipeline_mode = #tpu.pipeline_mode<synchronous>, transform_indices = @transform_2, window_bounds = array<i64: 1, 128>}, {pipeline_mode = #tpu.pipeline_mode<synchronous>, transform_indices = @transform_3, window_bounds = array<i64: 128, 128>}, {pipeline_mode = #tpu.pipeline_mode<synchronous>, transform_indices = @transform_4, window_bounds = array<i64: 1, 128>}, {transform_indices = @transform_5, window_bounds = array<i64: 8, 128>}]} {
    %c0 = arith.constant 0 : index
    %c0_0 = arith.constant 0 : index
    %0 = vector.load %arg1[%c0, %c0_0] : memref<8x128xf32, #tpu.memory_space<vmem>>, vector<8x128xf32>
    %1 = arith.truncf %0 : vector<8x128xf32> to vector<8x128xbf16>
    %c0_1 = arith.constant 0 : index
    %c0_2 = arith.constant 0 : index
    %2 = vector.load %arg2[%c0_1, %c0_2] : memref<128x128xbf16, #tpu.memory_space<vmem>>, vector<128x128xbf16>
    %cst = arith.constant dense<0.000000e+00> : vector<8x128xf32>
    %3 = tpu.matmul %1, %2, %cst {dimension_numbers = #tpu.dot_dimension_numbers<[1], [0], [0], [1], [0, 0, 1, 1], [], []>} : vector<8x128xbf16>, vector<128x128xbf16>, vector<8x128xf32> -> vector<8x128xf32>
    %c0_3 = arith.constant 0 : index
    %c0_4 = arith.constant 0 : index
    %4 = vector.load %arg3[%c0_3, %c0_4] : memref<1x128xf32, #tpu.memory_space<vmem>>, vector<1x128xf32>
    %5 = vector.broadcast %4 : vector<1x128xf32> to vector<8x128xf32>
    %6 = arith.addf %3, %5 : vector<8x128xf32>
    %cst_5 = arith.constant 0.000000e+00 : f32
    %7 = vector.broadcast %cst_5 : f32 to vector<8x128xf32>
    %8 = arith.maximumf %6, %7 : vector<8x128xf32>
    %9 = arith.truncf %8 : vector<8x128xf32> to vector<8x128xbf16>
    %c0_6 = arith.constant 0 : index
    %c0_7 = arith.constant 0 : index
    %10 = vector.load %arg4[%c0_6, %c0_7] : memref<128x128xbf16, #tpu.memory_space<vmem>>, vector<128x128xbf16>
    %cst_8 = arith.constant dense<0.000000e+00> : vector<8x128xf32>
    %11 = tpu.matmul %9, %10, %cst_8 {dimension_numbers = #tpu.dot_dimension_numbers<[1], [0], [0], [1], [0, 0, 1, 1], [], []>} : vector<8x128xbf16>, vector<128x128xbf16>, vector<8x128xf32> -> vector<8x128xf32>
    %c0_9 = arith.constant 0 : index
    %c0_10 = arith.constant 0 : index
    %12 = vector.load %arg5[%c0_9, %c0_10] : memref<1x128xf32, #tpu.memory_space<vmem>>, vector<1x128xf32>
    %13 = vector.broadcast %12 : vector<1x128xf32> to vector<8x128xf32>
    %14 = arith.addf %11, %13 : vector<8x128xf32>
    %c0_11 = arith.constant 0 : index
    %c0_12 = arith.constant 0 : index
    %15 = vector.load %arg1[%c0_11, %c0_12] : memref<8x128xf32, #tpu.memory_space<vmem>>, vector<8x128xf32>
    %16 = arith.addf %14, %15 : vector<8x128xf32>
    %cst_13 = arith.constant 0.000000e+00 : f32
    %17 = vector.broadcast %cst_13 : f32 to vector<8x128xf32>
    %18 = arith.maximumf %16, %17 : vector<8x128xf32>
    %c0_14 = arith.constant 0 : index
    %c0_15 = arith.constant 0 : index
    %19 = vector.load %arg6[%c0_14, %c0_15] : memref<8x128xf32, #tpu.memory_space<vmem>>, vector<8x128xf32>
    tpu.vector_store %arg6[%c0_14, %c0_15], %18 {strides = array<i32>} : memref<8x128xf32, #tpu.memory_space<vmem>>, vector<8x128xf32>,
    return
  }
  func.func @transform_0(%arg0: i32) -> (i32, i32) {
    %c0_i32 = arith.constant 0 : i32
    %c0_i32_0 = arith.constant 0 : i32
    return %arg0, %c0_i32 : i32, i32
  }
  func.func @transform_1(%arg0: i32) -> (i32, i32) {
    %c0_i32 = arith.constant 0 : i32
    %c0_i32_0 = arith.constant 0 : i32
    %c0_i32_1 = arith.constant 0 : i32
    return %c0_i32, %c0_i32_0 : i32, i32
  }
  func.func @transform_2(%arg0: i32) -> (i32, i32) {
    %c0_i32 = arith.constant 0 : i32
    %c0_i32_0 = arith.constant 0 : i32
    %c0_i32_1 = arith.constant 0 : i32
    return %c0_i32, %c0_i32_0 : i32, i32
  }
  func.func @transform_3(%arg0: i32) -> (i32, i32) {
    %c0_i32 = arith.constant 0 : i32
    %c0_i32_0 = arith.constant 0 : i32
    %c0_i32_1 = arith.constant 0 : i32
    return %c0_i32, %c0_i32_0 : i32, i32
  }
  func.func @transform_4(%arg0: i32) -> (i32, i32) {
    %c0_i32 = arith.constant 0 : i32
    %c0_i32_0 = arith.constant 0 : i32
    %c0_i32_1 = arith.constant 0 : i32
    return %c0_i32, %c0_i32_0 : i32, i32
  }
  func.func @transform_5(%arg0: i32) -> (i32, i32) {
    %c0_i32 = arith.constant 0 : i32
    %c0_i32_0 = arith.constant 0 : i32
    return %arg0, %c0_i32 : i32, i32
  }
}

</mosaic_0001>

<bundles_post_ra>
// kernel: _residual_block_padded.1
= control target key start
LH: loop header
LB: loop body
LE: loop exit
PB: predicated region body
PF: predicated region fallthrough
CT: control target
= control target key end

     0   :  { %10 = vsyncpa [#allocation3], 0  ;;  %s598_s0 = inlined_call_operand.hbm [shape: f32[8,128], index: 0, kind: input, shape index: {}, may-alias: {0,5}]   ;;  %s599_s1 = inlined_call_operand.hbm [shape: bf16[128,128], index: 1, kind: input, shape index: {}]   ;;  %s600_s2 = inlined_call_operand.vmem [shape: f32[1,128], index: 2, kind: input, shape index: {}]   ;;  %s601_s3 = inlined_call_operand.hbm [shape: bf16[128,128], index: 3, kind: input, shape index: {}]   ;;  %s602_s4 = inlined_call_operand.vmem [shape: f32[1,128], index: 4, kind: input, shape index: {}]   ;;  %s603_s5 = inlined_call_operand.hbm [shape: f32[8,128], index: 5, kind: output, shape index: {}, may-alias: {0,5}]  }
   0x1   :  { %11 = vsyncpa [#allocation6], 0 }
   0x2   :  { %12 = vsyncpa [#allocation4], 0  ;;  %s500_s18 = smov [#allocation5]   ;;  %s406_s22 = scalar_lea.hbm %s599_s1, 1024 }
   0x3   :  { %s28_s19 = sshll.u32 %s500_s18, 4  ;;  %p407_p0 = scmp.ne.s32.totalorder %s599_s1, %s406_s22  ;;  %s29_s19 = int_to_ptr.vmem [resolvable:$true] %s28_s19 }
   0x4   :  { %p410_p1 = scmp.lt.u32.totalorder %s406_s22, %s599_s1 }
   0x6   :  { %p412_p2 = pnand %p410_p1, %p407_p0 }
   0x8   :  { %415 = shalt.err (!%p412_p2)
}
   0x9   :  { %s416_s27 = scalar_lea.vmem %s29_s19, 1024  ;;  %p421_p4 = scmp.lt.s32.totalorder %s29_s19, %s29_s19 }
   0xa   :  { %p417_p3 = scmp.ne.s32.totalorder %s29_s19, %s416_s27  ;;  %p422_p5 = scmp.lt.s32.totalorder %s416_s27, %s416_s27 }
   0xc   :  { %p423_p6 = por %p422_p5, %p421_p4 }
   0xe   :  { %p424_p7 = pnand %p423_p6, %p417_p3 }
  0x10   :  { %427 = shalt.err (!%p424_p7)
}
  0x11   :  { %s501_s28 = smov 64   ;;  %s502_s29 = smov 4  }
  0x12   :  { %34 = dma.hbm_to_vmem [thread:$0]  %s599_s1, 1024, %s29_s19, [#allocation6], %s501_s28, %s501_s28, %s502_s29  }
  0x13   :  { %s503_s7 = smov [#allocation2]   ;;  %s504_s9 = smov [#allocation7]  }
  0x14   :  { %s19_s8 = sshll.u32 %s503_s7, 4  ;;  %s42_s10 = sshll.u32 %s504_s9, 4  ;;  %s20_s8 = int_to_ptr.vmem [resolvable:$true] %s19_s8  ;;  %s43_s10 = int_to_ptr.vmem [resolvable:$true] %s42_s10 }
  0x15   :  { %s428_s13 = scalar_lea.hbm %s598_s0, 128 }
  0x16   :  { %p429_p8 = scmp.ne.s32.totalorder %s598_s0, %s428_s13  ;;  %p432_p9 = scmp.lt.u32.totalorder %s428_s13, %s598_s0 }
  0x18   :  { %p434_p10 = pnand %p432_p9, %p429_p8 }
  0x1a   :  { %437 = shalt.err (!%p434_p10)
}
  0x1b   :  { %s438_s1 = scalar_lea.vmem %s20_s8, 128  ;;  %p443_p12 = scmp.lt.s32.totalorder %s20_s8, %s20_s8 }
  0x1c   :  { %p439_p11 = scmp.ne.s32.totalorder %s20_s8, %s438_s1  ;;  %p444_p13 = scmp.lt.s32.totalorder %s438_s1, %s438_s1 }
  0x1e   :  { %p445_p0 = por %p444_p13, %p443_p12 }
  0x20   :  { %p446_p1 = pnand %p445_p0, %p439_p11 }
  0x22   :  { %449 = shalt.err (!%p446_p1)
}
  0x23   :  { %22 = dma.hbm_to_vmem [thread:$0]  %s598_s0, 128, %s20_s8, [#allocation3]  }
  0x24   :  { %s450_s22 = scalar_lea.hbm %s601_s3, 1024 }
  0x25   :  { %p451_p2 = scmp.ne.s32.totalorder %s601_s3, %s450_s22  ;;  %p454_p3 = scmp.lt.u32.totalorder %s450_s22, %s601_s3 }
  0x27   :  { %p456_p4 = pnand %p454_p3, %p451_p2 }
  0x29   :  { %459 = shalt.err (!%p456_p4)
}
  0x2a   :  { %s460_s27 = scalar_lea.vmem %s43_s10, 1024  ;;  %p465_p6 = scmp.lt.s32.totalorder %s43_s10, %s43_s10 }
  0x2b   :  { %p461_p5 = scmp.ne.s32.totalorder %s43_s10, %s460_s27  ;;  %p466_p7 = scmp.lt.s32.totalorder %s460_s27, %s460_s27 }
  0x2d   :  { %p467_p8 = por %p466_p7, %p465_p6 }
  0x2f   :  { %p468_p9 = pnand %p467_p8, %p461_p5 }
  0x31   :  { %471 = shalt.err (!%p468_p9)
}
  0x32   :  { %48 = dma.hbm_to_vmem [thread:$0]  %s601_s3, 1024, %s43_s10, [#allocation6], %s501_s28, %s501_s28, %s502_s29  }
  0x33   :  { %494 = dma.done.wait [#allocation3], 128  }
  0x34   :  { %495 = vsyncadd [#allocation3], 4294967168 }
  0x35   :  { %496 = dma.done.wait [#allocation6], 2048  }
  0x36   :  { %497 = vsyncadd [#allocation6], 4294965248  ;;  %v505_v0 = vmov 0.0   ;;  %vm506_vm0 = vmmov 0   ;;  %v390_v1 = vld [vmem:[#allocation5] sm:$0xff]   ;;  %v391_v2 = vld [vmem:[#allocation5 + $0x8] sm:$0xff]  }
  0x37   :  { %342 = vmatprep.subr.bf16.mxu0 %v505_v0  ;;  %358 = vmatprep.mubr.msk.bf16.mxu0 %vm506_vm0, %v505_v0  ;;  %v392_v3 = vld [vmem:[#allocation5 + $0x10] sm:$0xff]   ;;  %v398_v4 = vld [vmem:[#allocation7] sm:$0xff]   ;;  %v393_v5 = vld [vmem:[#allocation5 + $0x18] sm:$0xff]   ;;  %s507_s7 = smov [#allocation8]  }
  0x38   :  { %362 = vmatprep.subr.bf16.mxu1 %v505_v0  ;;  %378 = vmatprep.mubr.msk.bf16.mxu1 %vm506_vm0, %v505_v0  ;;  %v399_v6 = vld [vmem:[#allocation7 + $0x8] sm:$0xff]   ;;  %v394_v7 = vld [vmem:[#allocation5 + $0x20] sm:$0xff]   ;;  %v400_v8 = vld [vmem:[#allocation7 + $0x10] sm:$0xff]   ;;  %s296_s8 = sshll.u32 %s507_s7, 4  ;;  %s297_s8 = int_to_ptr.vmem [resolvable:$true] %s296_s8 }
  0x39   :  { %343 = vmatpush3.bf16.msra.mxu0 %v390_v1  ;;  %363 = vmatpush3.bf16.msra.mxu1 %v398_v4  ;;  %v395_v9 = vld [vmem:[#allocation5 + $0x28] sm:$0xff]   ;;  %v401_v10 = vld [vmem:[#allocation7 + $0x18] sm:$0xff]   ;;  %v396_v11 = vld [vmem:[#allocation5 + $0x30] sm:$0xff]   ;;  %p477_p11 = scmp.lt.s32.totalorder %s297_s8, %s297_s8 }
  0x3a   :  { %344 = vmatprep.subr.bf16.mxu0 %v505_v0  ;;  %364 = vmatprep.subr.bf16.mxu1 %v505_v0  ;;  %v402_v12 = vld [vmem:[#allocation7 + $0x20] sm:$0xff]   ;;  %v397_v13 = vld [vmem:[#allocation5 + $0x38] sm:$0xff]   ;;  %v403_v15 = vld [vmem:[#allocation7 + $0x28] sm:$0xff]  }
  0x3b   :  { %v61_v14 = vld [vmem:[#allocation2] sm:$0xff]  ;;  %v404_v17 = vld [vmem:[#allocation7 + $0x30] sm:$0xff]  }
  0x3c   :  { %v62_v16 = vpack.c.bf16 %v61_v14, %v61_v14  ;;  %v405_v18 = vld [vmem:[#allocation7 + $0x38] sm:$0xff]  }
  0x3d   :  { %345 = vmatpush3.bf16.msra.mxu0 %v391_v2  ;;  %365 = vmatpush3.bf16.msra.mxu1 %v399_v6  ;;  %v306_v19 = vld [vmem:[%s600_s2] ss:$0 sm:$0xff]  ;;  %s472_s2 = scalar_lea.vmem %s297_s8, 128 }
  0x3e   :  { %346 = vmatprep.subr.bf16.mxu0 %v505_v0  ;;  %366 = vmatprep.subr.bf16.mxu1 %v505_v0  ;;  %v315_v27 = vld [vmem:[%s602_s4] ss:$0 sm:$0xff]  ;;  %p473_p10 = scmp.ne.s32.totalorder %s297_s8, %s472_s2  ;;  %p478_p12 = scmp.lt.s32.totalorder %s472_s2, %s472_s2 }
  0x40   :  { %p479_p13 = por %p478_p12, %p477_p11 }
  0x41   :  { %347 = vmatpush3.bf16.msra.mxu0 %v392_v3  ;;  %367 = vmatpush3.bf16.msra.mxu1 %v400_v8 }
  0x42   :  { %348 = vmatprep.subr.bf16.mxu0 %v505_v0  ;;  %368 = vmatprep.subr.bf16.mxu1 %v505_v0  ;;  %p480_p0 = pnand %p479_p13, %p473_p10 }
  0x45   :  { %349 = vmatpush3.bf16.msra.mxu0 %v393_v5  ;;  %369 = vmatpush3.bf16.msra.mxu1 %v401_v10 }
  0x46   :  { %350 = vmatprep.subr.bf16.mxu0 %v505_v0  ;;  %370 = vmatprep.subr.bf16.mxu1 %v505_v0 }
  0x49   :  { %351 = vmatpush3.bf16.msra.mxu0 %v394_v7  ;;  %371 = vmatpush3.bf16.msra.mxu1 %v402_v12 }
  0x4a   :  { %352 = vmatprep.subr.bf16.mxu0 %v505_v0  ;;  %372 = vmatprep.subr.bf16.mxu1 %v505_v0 }
  0x4d   :  { %353 = vmatpush3.bf16.msra.mxu0 %v395_v9  ;;  %373 = vmatpush3.bf16.msra.mxu1 %v403_v15 }
  0x4e   :  { %354 = vmatprep.subr.bf16.mxu0 %v505_v0  ;;  %374 = vmatprep.subr.bf16.mxu1 %v505_v0 }
  0x51   :  { %355 = vmatpush3.bf16.msra.mxu0 %v396_v11  ;;  %375 = vmatpush3.bf16.msra.mxu1 %v404_v17 }
  0x52   :  { %356 = vmatprep.subr.bf16.mxu0 %v505_v0  ;;  %376 = vmatprep.subr.bf16.mxu1 %v505_v0 }
  0x55   :  { %357 = vmatpush3.bf16.msra.mxu0 %v397_v13  ;;  %377 = vmatpush3.bf16.msra.mxu1 %v405_v18 }
  0x58   :  { %359 = vmatmul.mubr.bf16.vlgmr.msra.gmra.mrb[0].mxu0 %v62_v16 }
 0x12b   :  { %v168_v20 = vpop.f32.mrb[0].mxu0 }
 0x12c   :  { %v169_v21 = vadd.f32 %v306_v19, %v168_v20  ;;  %v360_v22 = vpop.f32.mrb[1].mxu0 }
 0x12d   :  { %v171_v23 = vpop.f32.mrb[2].mxu0 }
 0x12e   :  { %v174_v24 = vmax.f32 %v169_v21, 0.0  ;;  %v361_v25 = vpop.f32.mrb[3].mxu0 }
 0x130   :  { %v175_v26 = vpack.c.bf16 %v174_v24, %v174_v24 }
 0x132   :  { %379 = vmatmul.mubr.bf16.vlgmr.msra.gmra.mrb[0].mxu1 %v175_v26 }
 0x205   :  { %v281_v28 = vpop.f32.mrb[0].mxu1 }
 0x206   :  { %v282_v29 = vadd.f32 %v315_v27, %v281_v28  ;;  %v380_v30 = vpop.f32.mrb[1].mxu1 }
 0x207   :  { %v284_v31 = vpop.f32.mrb[2].mxu1 }
 0x208   :  { %v287_v32 = vadd.f32 %v282_v29, %v61_v14  ;;  %v381_v33 = vpop.f32.mrb[3].mxu1 }
 0x20a   :  { %v288_v34 = vmax.f32 %v287_v32, 0.0 }
 0x20c   :  { %289 = vst [vmem:[#allocation8] sm:$0xff] %v288_v34 }
 0x20d   :  { %483 = shalt.err (!%p480_p0)
}
 0x20e   :  { %s484_s10 = scalar_lea.hbm %s603_s5, 128 }
 0x20f   :  { %p485_p1 = scmp.ne.s32.totalorder %s603_s5, %s484_s10  ;;  %p488_p2 = scmp.lt.u32.totalorder %s484_s10, %s603_s5 }
 0x211   :  { %p490_p3 = pnand %p488_p2, %p485_p1 }
 0x213   :  { %493 = shalt.err (!%p490_p3)
}
 0x214   :  { %299 = dma.vmem_to_hbm [thread:$0]  %s297_s8, 128, %s603_s5, [#allocation4]  }
 0x215   :  { %498 = dma.done.wait [#allocation4], 128  }
 0x216   :  { %499 = vsyncadd [#allocation4], 4294967168 }
 0x217   :  { %303 = vsyncpa [#allocation3], 1 }
 0x218   :  { %304 = vsyncpa [#allocation6], 1 }
 0x219   :  { %305 = vsyncpa [#allocation4], 1 }

// kernel: _residual_block_padded.1
= control target key start
LH: loop header
LB: loop body
LE: loop exit
PB: predicated region body
PF: predicated region fallthrough
CT: control target
= control target key end

     0   :  { %10 = vsyncpa [#allocation3], 0  ;;  %s598_s0 = inlined_call_operand.hbm [shape: f32[8,128], index: 0, kind: input, shape index: {}, may-alias: {0,5}]   ;;  %s599_s1 = inlined_call_operand.hbm [shape: bf16[128,128], index: 1, kind: input, shape index: {}]   ;;  %s600_s2 = inlined_call_operand.vmem [shape: f32[1,128], index: 2, kind: input, shape index: {}]   ;;  %s601_s3 = inlined_call_operand.hbm [shape: bf16[128,128], index: 3, kind: input, shape index: {}]   ;;  %s602_s4 = inlined_call_operand.vmem [shape: f32[1,128], index: 4, kind: input, shape index: {}]   ;;  %s603_s5 = inlined_call_operand.hbm [shape: f32[8,128], index: 5, kind: output, shape index: {}, may-alias: {0,5}]  }
   0x1   :  { %11 = vsyncpa [#allocation6], 0 }
   0x2   :  { %12 = vsyncpa [#allocation4], 0  ;;  %s500_s18 = smov [#allocation5]   ;;  %s406_s22 = scalar_lea.hbm %s599_s1, 1024 }
   0x3   :  { %s28_s19 = sshll.u32 %s500_s18, 4  ;;  %p407_p0 = scmp.ne.s32.totalorder %s599_s1, %s406_s22  ;;  %s29_s19 = int_to_ptr.vmem [resolvable:$true] %s28_s19 }
   0x4   :  { %p410_p1 = scmp.lt.u32.totalorder %s406_s22, %s599_s1 }
   0x6   :  { %p412_p2 = pnand %p410_p1, %p407_p0 }
   0x8   :  { %415 = shalt.err (!%p412_p2)
}
   0x9   :  { %s416_s27 = scalar_lea.vmem %s29_s19, 1024  ;;  %p421_p4 = scmp.lt.s32.totalorder %s29_s19, %s29_s19 }
   0xa   :  { %p417_p3 = scmp.ne.s32.totalorder %s29_s19, %s416_s27  ;;  %p422_p5 = scmp.lt.s32.totalorder %s416_s27, %s416_s27 }
   0xc   :  { %p423_p6 = por %p422_p5, %p421_p4 }
   0xe   :  { %p424_p7 = pnand %p423_p6, %p417_p3 }
  0x10   :  { %427 = shalt.err (!%p424_p7)
}
  0x11   :  { %s501_s28 = smov 64   ;;  %s502_s29 = smov 4  }
  0x12   :  { %34 = dma.hbm_to_vmem [thread:$0]  %s599_s1, 1024, %s29_s19, [#allocation6], %s501_s28, %s501_s28, %s502_s29  }
  0x13   :  { %s503_s7 = smov [#allocation2]   ;;  %s504_s9 = smov [#allocation7]  }
  0x14   :  { %s19_s8 = sshll.u32 %s503_s7, 4  ;;  %s42_s10 = sshll.u32 %s504_s9, 4  ;;  %s20_s8 = int_to_ptr.vmem [resolvable:$true] %s19_s8  ;;  %s43_s10 = int_to_ptr.vmem [resolvable:$true] %s42_s10 }
  0x15   :  { %s428_s13 = scalar_lea.hbm %s598_s0, 128 }
  0x16   :  { %p429_p8 = scmp.ne.s32.totalorder %s598_s0, %s428_s13  ;;  %p432_p9 = scmp.lt.u32.totalorder %s428_s13, %s598_s0 }
  0x18   :  { %p434_p10 = pnand %p432_p9, %p429_p8 }
  0x1a   :  { %437 = shalt.err (!%p434_p10)
}
  0x1b   :  { %s438_s1 = scalar_lea.vmem %s20_s8, 128  ;;  %p443_p12 = scmp.lt.s32.totalorder %s20_s8, %s20_s8 }
  0x1c   :  { %p439_p11 = scmp.ne.s32.totalorder %s20_s8, %s438_s1  ;;  %p444_p13 = scmp.lt.s32.totalorder %s438_s1, %s438_s1 }
  0x1e   :  { %p445_p0 = por %p444_p13, %p443_p12 }
  0x20   :  { %p446_p1 = pnand %p445_p0, %p439_p11 }
  0x22   :  { %449 = shalt.err (!%p446_p1)
}
  0x23   :  { %22 = dma.hbm_to_vmem [thread:$0]  %s598_s0, 128, %s20_s8, [#allocation3]  }
  0x24   :  { %s450_s22 = scalar_lea.hbm %s601_s3, 1024 }
  0x25   :  { %p451_p2 = scmp.ne.s32.totalorder %s601_s3, %s450_s22  ;;  %p454_p3 = scmp.lt.u32.totalorder %s450_s22, %s601_s3 }
  0x27   :  { %p456_p4 = pnand %p454_p3, %p451_p2 }
  0x29   :  { %459 = shalt.err (!%p456_p4)
}
  0x2a   :  { %s460_s27 = scalar_lea.vmem %s43_s10, 1024  ;;  %p465_p6 = scmp.lt.s32.totalorder %s43_s10, %s43_s10 }
  0x2b   :  { %p461_p5 = scmp.ne.s32.totalorder %s43_s10, %s460_s27  ;;  %p466_p7 = scmp.lt.s32.totalorder %s460_s27, %s460_s27 }
  0x2d   :  { %p467_p8 = por %p466_p7, %p465_p6 }
  0x2f   :  { %p468_p9 = pnand %p467_p8, %p461_p5 }
  0x31   :  { %471 = shalt.err (!%p468_p9)
}
  0x32   :  { %48 = dma.hbm_to_vmem [thread:$0]  %s601_s3, 1024, %s43_s10, [#allocation6], %s501_s28, %s501_s28, %s502_s29  }
  0x33   :  { %494 = dma.done.wait [#allocation3], 128  }
  0x34   :  { %495 = vsyncadd [#allocation3], 4294967168 }
  0x35   :  { %496 = dma.done.wait [#allocation6], 2048  }
  0x36   :  { %497 = vsyncadd [#allocation6], 4294965248  ;;  %v505_v0 = vmov 0.0   ;;  %vm506_vm0 = vmmov 0   ;;  %v390_v1 = vld [vmem:[#allocation5] sm:$0xff]   ;;  %v391_v2 = vld [vmem:[#allocation5 + $0x8] sm:$0xff]  }
  0x37   :  { %342 = vmatprep.subr.bf16.mxu0 %v505_v0  ;;  %358 = vmatprep.mubr.msk.bf16.mxu0 %vm506_vm0, %v505_v0  ;;  %v392_v3 = vld [vmem:[#allocation5 + $0x10] sm:$0xff]   ;;  %v398_v4 = vld [vmem:[#allocation7] sm:$0xff]   ;;  %v393_v5 = vld [vmem:[#allocation5 + $0x18] sm:$0xff]   ;;  %s507_s7 = smov [#allocation8]  }
  0x38   :  { %362 = vmatprep.subr.bf16.mxu1 %v505_v0  ;;  %378 = vmatprep.mubr.msk.bf16.mxu1 %vm506_vm0, %v505_v0  ;;  %v399_v6 = vld [vmem:[#allocation7 + $0x8] sm:$0xff]   ;;  %v394_v7 = vld [vmem:[#allocation5 + $0x20] sm:$0xff]   ;;  %v400_v8 = vld [vmem:[#allocation7 + $0x10] sm:$0xff]   ;;  %s296_s8 = sshll.u32 %s507_s7, 4  ;;  %s297_s8 = int_to_ptr.vmem [resolvable:$true] %s296_s8 }
  0x39   :  { %343 = vmatpush3.bf16.msra.mxu0 %v390_v1  ;;  %363 = vmatpush3.bf16.msra.mxu1 %v398_v4  ;;  %v395_v9 = vld [vmem:[#allocation5 + $0x28] sm:$0xff]   ;;  %v401_v10 = vld [vmem:[#allocation7 + $0x18] sm:$0xff]   ;;  %v396_v11 = vld [vmem:[#allocation5 + $0x30] sm:$0xff]   ;;  %p477_p11 = scmp.lt.s32.totalorder %s297_s8, %s297_s8 }
  0x3a   :  { %344 = vmatprep.subr.bf16.mxu0 %v505_v0  ;;  %364 = vmatprep.subr.bf16.mxu1 %v505_v0  ;;  %v402_v12 = vld [vmem:[#allocation7 + $0x20] sm:$0xff]   ;;  %v397_v13 = vld [vmem:[#allocation5 + $0x38] sm:$0xff]   ;;  %v403_v15 = vld [vmem:[#allocation7 + $0x28] sm:$0xff]  }
  0x3b   :  { %v61_v14 = vld [vmem:[#allocation2] sm:$0xff]  ;;  %v404_v17 = vld [vmem:[#allocation7 + $0x30] sm:$0xff]  }
  0x3c   :  { %v62_v16 = vpack.c.bf16 %v61_v14, %v61_v14  ;;  %v405_v18 = vld [vmem:[#allocation7 + $0x38] sm:$0xff]  }
  0x3d   :  { %345 = vmatpush3.bf16.msra.mxu0 %v391_v2  ;;  %365 = vmatpush3.bf16.msra.mxu1 %v399_v6  ;;  %v306_v19 = vld [vmem:[%s600_s2] ss:$0 sm:$0xff]  ;;  %s472_s2 = scalar_lea.vmem %s297_s8, 128 }
  0x3e   :  { %346 = vmatprep.subr.bf16.mxu0 %v505_v0  ;;  %366 = vmatprep.subr.bf16.mxu1 %v505_v0  ;;  %v315_v27 = vld [vmem:[%s602_s4] ss:$0 sm:$0xff]  ;;  %p473_p10 = scmp.ne.s32.totalorder %s297_s8, %s472_s2  ;;  %p478_p12 = scmp.lt.s32.totalorder %s472_s2, %s472_s2 }
  0x40   :  { %p479_p13 = por %p478_p12, %p477_p11 }
  0x41   :  { %347 = vmatpush3.bf16.msra.mxu0 %v392_v3  ;;  %367 = vmatpush3.bf16.msra.mxu1 %v400_v8 }
  0x42   :  { %348 = vmatprep.subr.bf16.mxu0 %v505_v0  ;;  %368 = vmatprep.subr.bf16.mxu1 %v505_v0  ;;  %p480_p0 = pnand %p479_p13, %p473_p10 }
  0x45   :  { %349 = vmatpush3.bf16.msra.mxu0 %v393_v5  ;;  %369 = vmatpush3.bf16.msra.mxu1 %v401_v10 }
  0x46   :  { %350 = vmatprep.subr.bf16.mxu0 %v505_v0  ;;  %370 = vmatprep.subr.bf16.mxu1 %v505_v0 }
  0x49   :  { %351 = vmatpush3.bf16.msra.mxu0 %v394_v7  ;;  %371 = vmatpush3.bf16.msra.mxu1 %v402_v12 }
  0x4a   :  { %352 = vmatprep.subr.bf16.mxu0 %v505_v0  ;;  %372 = vmatprep.subr.bf16.mxu1 %v505_v0 }
  0x4d   :  { %353 = vmatpush3.bf16.msra.mxu0 %v395_v9  ;;  %373 = vmatpush3.bf16.msra.mxu1 %v403_v15 }
  0x4e   :  { %354 = vmatprep.subr.bf16.mxu0 %v505_v0  ;;  %374 = vmatprep.subr.bf16.mxu1 %v505_v0 }
  0x51   :  { %355 = vmatpush3.bf16.msra.mxu0 %v396_v11  ;;  %375 = vmatpush3.bf16.msra.mxu1 %v404_v17 }
  0x52   :  { %356 = vmatprep.subr.bf16.mxu0 %v505_v0  ;;  %376 = vmatprep.subr.bf16.mxu1 %v505_v0 }
  0x55   :  { %357 = vmatpush3.bf16.msra.mxu0 %v397_v13  ;;  %377 = vmatpush3.bf16.msra.mxu1 %v405_v18 }
  0x58   :  { %359 = vmatmul.mubr.bf16.vlgmr.msra.gmra.mrb[0].mxu0 %v62_v16 }
 0x12b   :  { %v168_v20 = vpop.f32.mrb[0].mxu0 }
 0x12c   :  { %v169_v21 = vadd.f32 %v306_v19, %v168_v20  ;;  %v360_v22 = vpop.f32.mrb[1].mxu0 }
 0x12d   :  { %v171_v23 = vpop.f32.mrb[2].mxu0 }
 0x12e   :  { %v174_v24 = vmax.f32 %v169_v21, 0.0  ;;  %v361_v25 = vpop.f32.mrb[3].mxu0 }
 0x130   :  { %v175_v26 = vpack.c.bf16 %v174_v24, %v174_v24 }
 0x132   :  { %379 = vmatmul.mubr.bf16.vlgmr.msra.gmra.mrb[0].mxu1 %v175_v26 }
 0x205   :  { %v281_v28 = vpop.f32.mrb[0].mxu1 }
 0x206   :  { %v282_v29 = vadd.f32 %v315_v27, %v281_v28  ;;  %v380_v30 = vpop.f32.mrb[1].mxu1 }
 0x207   :  { %v284_v31 = vpop.f32.mrb[2].mxu1 }
 0x208   :  { %v287_v32 = vadd.f32 %v282_v29, %v61_v14  ;;  %v381_v33 = vpop.f32.mrb[3].mxu1 }
 0x20a   :  { %v288_v34 = vmax.f32 %v287_v32, 0.0 }
 0x20c   :  { %289 = vst [vmem:[#allocation8] sm:$0xff] %v288_v34 }
 0x20d   :  { %483 = shalt.err (!%p480_p0)
}
 0x20e   :  { %s484_s10 = scalar_lea.hbm %s603_s5, 128 }
 0x20f   :  { %p485_p1 = scmp.ne.s32.totalorder %s603_s5, %s484_s10  ;;  %p488_p2 = scmp.lt.u32.totalorder %s484_s10, %s603_s5 }
 0x211   :  { %p490_p3 = pnand %p488_p2, %p485_p1 }
 0x213   :  { %493 = shalt.err (!%p490_p3)
}
 0x214   :  { %299 = dma.vmem_to_hbm [thread:$0]  %s297_s8, 128, %s603_s5, [#allocation4]  }
 0x215   :  { %498 = dma.done.wait [#allocation4], 128  }
 0x216   :  { %499 = vsyncadd [#allocation4], 4294967168 }
 0x217   :  { %303 = vsyncpa [#allocation3], 1 }
 0x218   :  { %304 = vsyncpa [#allocation6], 1 }
 0x219   :  { %305 = vsyncpa [#allocation4], 1 }

</bundles_post_ra>
